<compile_context>
chip_gen: v5e
topology: v5e:2x2
jax: 0.10.0
libtpu: 0.0.40
codegen_flags: <defaults>
</compile_context>

<pallas_src>
import jax
import jax.numpy as jnp
from jax.experimental import pallas as pl
from jax.experimental.pallas import tpu as pltpu

_MAX_LANE = 512        # widest lane-dense slab width (multiple of 128)
_MAX_BLOCK_ROWS = 512  # 512x512 f32 block = 1 MiB: amortises the ~0.35 us
                       # per-step overhead while staying inside v5e's 16 MiB
                       # scoped VMEM and leaving headroom on v7x (64 MiB).


# ---------------------------------------------------------------------------
# Layout / planning helpers (all static Python, trace-time only)
# ---------------------------------------------------------------------------
def _round_up(x, m):
    return ((x + m - 1) // m) * m


def _choose_layout(n):
    """Pick a lane width so flatten->reshape is zero-copy when possible."""
    for lane in (512, 256, 128):
        if n % lane == 0:
            return lane, n // lane, False
    # Ragged element count (n % 128 != 0): rare fallback, pad the flat array.
    lane = _MAX_LANE
    return lane, -(-n // lane), True


def _as_slab(x, rows, lane, needs_pad):
    flat = x.reshape(-1)
    if needs_pad:
        flat = jnp.pad(flat, (0, rows * lane - flat.shape[0]))
    return flat.reshape(rows, lane)


def _sum_plan(rows_total, itemsize):
    """(block_rows, n_cores, steps) for the streaming reduction."""
    max_rows = _MAX_BLOCK_ROWS if itemsize >= 4 else 2 * _MAX_BLOCK_ROWS
    if rows_total <= 16:
        return rows_total, 1, 1          # single full-extent block
    # Target ~8 row-blocks so each core gets >= 2-4 pipelined steps.
    want = min(max_rows, _round_up(pl.cdiv(rows_total, 8), 8))
    block_rows = want
    if rows_total % want != 0:
        # Prefer an exact multiple-of-8 divisor close to `want` (no ragged
        # last block); otherwise keep `want` and mask the tail in-kernel.
        for d in range(want, max(want // 2, 8) - 1, -8):
            if rows_total % d == 0:
                block_rows = d
                break
    total_blocks = pl.cdiv(rows_total, block_rows)
    n_cores = 2 if (total_blocks >= 4 and total_blocks % 2 == 0) else 1
    steps = total_blocks // n_cores
    return block_rows, n_cores, steps


def _elem_plan(rows_total, itemsize):
    max_rows = _MAX_BLOCK_ROWS if itemsize >= 4 else 2 * _MAX_BLOCK_ROWS
    if rows_total <= max_rows:
        return rows_total, 1             # full-extent single block
    block_rows = max_rows
    if rows_total % block_rows != 0:
        for d in range(max_rows, max(max_rows // 4, 8) - 1, -8):
            if rows_total % d == 0:
                block_rows = d
                break
    # If still ragged, Pallas clips out-of-bounds output writes at the
    # boundary block, so no padding is needed.
    return block_rows, pl.cdiv(rows_total, block_rows)


# ---------------------------------------------------------------------------
# Pallas kernels
# ---------------------------------------------------------------------------
def _make_sum_kernel(block_rows, lane, steps, rows_total, weighted):
    """Streaming |p-t| (optionally * w) reduction into a tiny resident block."""
    ragged = (rows_total % block_rows) != 0

    def kernel(*refs):
        if weighted:
            p_ref, t_ref, w_ref, acc_ref, wacc_ref = refs
        else:
            p_ref, t_ref, acc_ref = refs

        s = pl.program_id(1)

        @pl.when(s == 0)
        def _():
            acc_ref[...] = jnp.zeros_like(acc_ref)
            if weighted:
                wacc_ref[...] = jnp.zeros_like(wacc_ref)

        d = jnp.abs(p_ref[...].astype(jnp.float32)
                    - t_ref[...].astype(jnp.float32))
        if weighted:
            w = w_ref[...].astype(jnp.float32)
            d = d * w

        if ragged:
            # Only the very last row-block can be ragged; mask it with a
            # static-shape iota compare (couple of VPU ops, hidden under DMA).
            blk = pl.program_id(0) * steps + s
            valid = rows_total - blk * block_rows
            rows = jax.lax.broadcasted_iota(jnp.int32, (block_rows, lane), 0)
            keep = rows < valid
            d = jnp.where(keep, d, 0.0)
            if weighted:
                w = jnp.where(keep, w, 0.0)

        # Fold the whole block into row 0 of the resident (8, lane) output
        # block (XLU cross-sublane reduce; XLU is idle in this HBM-bound
        # kernel).  Only n_cores * 8 * lane f32 ever reach HBM.
        acc_ref[0:1, :] += jnp.sum(d, axis=0, keepdims=True)
        if weighted:
            wacc_ref[0:1, :] += jnp.sum(w, axis=0, keepdims=True)

    return kernel


def _make_elem_kernel(weighted, loss_weight):
    lw = float(loss_weight)

    def kernel(*refs):
        if weighted:
            p_ref, t_ref, w_ref, o_ref = refs
        else:
            p_ref, t_ref, o_ref = refs
        d = jnp.abs(p_ref[...] - t_ref[...])
        if weighted:
            d = d * w_ref[...].astype(d.dtype)
        if lw != 1.0:
            d = d * jnp.asarray(lw, dtype=d.dtype)   # folded loss_weight (free VPU mul)
        o_ref[...] = d.astype(o_ref.dtype)

    return kernel


# ---------------------------------------------------------------------------
# Drivers
# ---------------------------------------------------------------------------
def _pallas_abs_sum(pred, target, weight=None):
    """Returns (sum(|p-t| * w), sum(w) or None) as f32 scalars."""
    n = pred.size
    lane, rows_total, needs_pad = _choose_layout(n)
    itemsize = jnp.dtype(pred.dtype).itemsize
    block_rows, n_cores, steps = _sum_plan(rows_total, itemsize)
    weighted = weight is not None

    p2 = _as_slab(pred, rows_total, lane, needs_pad)
    t2 = _as_slab(target, rows_total, lane, needs_pad)

    kernel = _make_sum_kernel(block_rows, lane, steps, rows_total, weighted)
    in_spec = pl.BlockSpec((block_rows, lane), lambda c, s: (c * steps + s, 0))
    out_spec = pl.BlockSpec((8, lane), lambda c, s: (c, 0))   # resident per core
    acc_shape = jax.ShapeDtypeStruct((n_cores * 8, lane), jnp.float32)
    cparams = pltpu.CompilerParams(
        dimension_semantics=("parallel", "arbitrary"))

    if not weighted:
        acc = pl.pallas_call(
            kernel,
            out_shape=acc_shape,
            grid=(n_cores, steps),
            in_specs=[in_spec, in_spec],
            out_specs=out_spec,
            compiler_params=cparams,
        )(p2, t2)
        return jnp.sum(acc), None

    w2 = _as_slab(weight, rows_total, lane, needs_pad)
    acc, wacc = pl.pallas_call(
        kernel,
        out_shape=(acc_shape, acc_shape),
        grid=(n_cores, steps),
        in_specs=[in_spec, in_spec, in_spec],
        out_specs=(out_spec, out_spec),
        compiler_params=cparams,
    )(p2, t2, w2)
    return jnp.sum(acc), jnp.sum(wacc)


def _pallas_abs_elem(pred, target, weight=None, loss_weight=1.0):
    orig_shape = pred.shape
    out_dtype = pred.dtype
    n = pred.size

    lane, rows_total, needs_pad = _choose_layout(n)
    itemsize = jnp.dtype(pred.dtype).itemsize
    block_rows, num_blocks = _elem_plan(rows_total, itemsize)

    p2 = _as_slab(pred, rows_total, lane, needs_pad)
    t2 = _as_slab(target, rows_total, lane, needs_pad)
    args = [p2, t2]
    if weight is not None:
        args.append(_as_slab(weight, rows_total, lane, needs_pad))

    spec = pl.BlockSpec((block_rows, lane), lambda i: (i, 0))
    cparams = pltpu.CompilerParams(dimension_semantics=("parallel",))
    out_shape = jax.ShapeDtypeStruct((rows_total, lane), out_dtype)

    out = pl.pallas_call(
        _make_elem_kernel(weight is not None, loss_weight),
        out_shape=out_shape,
        grid=(num_blocks,),
        in_specs=[spec] * len(args),
        out_specs=spec,
        compiler_params=cparams,
    )(*args)

    if needs_pad:
        return out.reshape(-1)[:n].reshape(orig_shape)
    return out.reshape(orig_shape)


# ---------------------------------------------------------------------------
# Module-equivalent wrapper
# ---------------------------------------------------------------------------
class L1Loss:
    """L1 (MAE) loss — Pallas-backed forward matching the PyTorch module."""

    def __init__(self, loss_weight=1.0, reduction='mean'):
        if reduction not in ('none', 'mean', 'sum'):
            raise ValueError(
                f'Unsupported reduction mode: {reduction}. '
                f"Supported ones are: ['none', 'mean', 'sum']")
        self.loss_weight = loss_weight
        self.reduction = reduction

    def __call__(self, pred, target, weight=None, **kwargs):
        if weight is not None and weight.shape != pred.shape:
            # basicsr broadcasts e.g. (N,1,H,W) weights over channels; after
            # broadcasting, sum(weight) equals basicsr's weighted-mean denom.
            weight = jnp.broadcast_to(weight, pred.shape)

        if self.reduction == 'none':
            # loss_weight is folded into the kernel (no extra XLA multiply).
            return _pallas_abs_elem(pred, target, weight, self.loss_weight)

        s, wsum = _pallas_abs_sum(pred, target, weight)

        if self.reduction == 'sum':
            return (self.loss_weight * s).astype(pred.dtype)

        # reduction == 'mean'
        denom = float(pred.size) if weight is None else wsum
        return (self.loss_weight * (s / denom)).astype(pred.dtype)


# ---------------------------------------------------------------------------
# Self-test
# ---------------------------------------------------------------------------
if __name__ == "__main__":
    root = jax.random.PRNGKey(0)

    def reference(pred, target, weight, reduction, loss_weight):
        p = pred.astype(jnp.float32)
        t = target.astype(jnp.float32)
        l = jnp.abs(p - t)
        wb = None
        if weight is not None:
            wb = jnp.broadcast_to(weight, pred.shape).astype(jnp.float32)
            l = l * wb
        if reduction == 'none':
            return loss_weight * l
        if reduction == 'sum':
            return loss_weight * jnp.sum(l)
        if weight is None:
            return loss_weight * jnp.mean(l)
        return loss_weight * jnp.sum(l) / jnp.sum(wb)

    cases = [
        # tiny NCHW, single full-extent block + broadcast weight + loss_weight fold
        dict(shape=(2, 4, 16, 16), dtype=jnp.float32, wshape=(2, 1, 16, 16), lw=0.5),
        # mid-size: 2-"core" x multi-step reduction plan
        dict(shape=(2, 4, 64, 128), dtype=jnp.float32, wshape=None, lw=1.0),
        # ragged row-blocks -> in-kernel tail mask, full-shape weight
        dict(shape=(2, 4, 50, 128), dtype=jnp.float32, wshape=(2, 4, 50, 128), lw=1.0),
        # element count not divisible by 128 -> pad fallback path
        dict(shape=(3, 3, 13, 17), dtype=jnp.float32, wshape=None, lw=1.0),
        # bf16 streaming with f32 accumulation, doubled block rows
        dict(shape=(2, 4, 32, 64), dtype=jnp.bfloat16, wshape=None, lw=1.0),
    ]

    for idx, case in enumerate(cases):
        kp, kt, kw = jax.random.split(jax.random.fold_in(root, idx), 3)
        pred = jax.random.normal(kp, case["shape"], dtype=jnp.float32).astype(case["dtype"])
        target = jax.random.normal(kt, case["shape"], dtype=jnp.float32).astype(case["dtype"])
        weight = None
        if case["wshape"] is not None:
            weight = jax.random.uniform(kw, case["wshape"], dtype=jnp.float32).astype(case["dtype"])

        is_bf16 = case["dtype"] == jnp.bfloat16
        rtol = 2e-2 if is_bf16 else 1e-5
        atol = 2e-2 if is_bf16 else 1e-4

        for reduction in ("mean", "sum", "none"):
            loss_fn = L1Loss(loss_weight=case["lw"], reduction=reduction)
            weight_options = [None] + ([weight] if weight is not None else [])
            for w in weight_options:
                out = loss_fn(pred, target, w)
                jax.block_until_ready(out)
                ref = reference(pred, target, w, reduction, case["lw"])
                ok = jnp.allclose(out.astype(jnp.float32), ref, rtol=rtol, atol=atol)
                assert bool(ok), (case["shape"], str(case["dtype"]), reduction,
                                  w is not None, out, ref)

    print("KERNEL_OK")
</pallas_src>

<mosaic_0001>
module attributes {stable_mosaic.version = 11 : i64} {
  func.func @kernel(%arg0: i32, %arg1: i32, %arg2: memref<4x512xf32, #tpu.memory_space<vmem>>, %arg3: memref<4x512xf32, #tpu.memory_space<vmem>>, %arg4: memref<8x512xf32, #tpu.memory_space<vmem>>) attributes {dimension_semantics = [#tpu.dimension_semantics<parallel>, #tpu.dimension_semantics<arbitrary>], iteration_bounds = array<i64: 1, 1>, scalar_prefetch = 0 : i64, scratch_operands = 0 : i64, tpu.core_type = #tpu.core_type<tc>, window_params = [{transform_indices = @transform_0, window_bounds = array<i64: 4, 512>}, {transform_indices = @transform_1, window_bounds = array<i64: 4, 512>}, {transform_indices = @transform_2, window_bounds = array<i64: 8, 512>}]} {
    %c0_i32 = arith.constant 0 : i32
    %0 = arith.cmpi eq, %arg1, %c0_i32 : i32
    %1 = arith.extui %0 : i1 to i32
    %c0_i32_0 = arith.constant 0 : i32
    %2 = arith.cmpi ne, %1, %c0_i32_0 : i32
    scf.if %2 {
      %cst_8 = arith.constant 0.000000e+00 : f32
      %12 = vector.broadcast %cst_8 : f32 to vector<8x512xf32>
      %c0_9 = arith.constant 0 : index
      %c0_10 = arith.constant 0 : index
      %13 = vector.load %arg4[%c0_9, %c0_10] : memref<8x512xf32, #tpu.memory_space<vmem>>, vector<8x512xf32>
      tpu.vector_store %arg4[%c0_9, %c0_10], %12 {strides = array<i32>} : memref<8x512xf32, #tpu.memory_space<vmem>>, vector<8x512xf32>,
    } else {
    }
    %c0 = arith.constant 0 : index
    %c0_1 = arith.constant 0 : index
    %3 = vector.load %arg2[%c0, %c0_1] : memref<4x512xf32, #tpu.memory_space<vmem>>, vector<4x512xf32>
    %c0_2 = arith.constant 0 : index
    %c0_3 = arith.constant 0 : index
    %4 = vector.load %arg3[%c0_2, %c0_3] : memref<4x512xf32, #tpu.memory_space<vmem>>, vector<4x512xf32>
    %5 = arith.subf %3, %4 : vector<4x512xf32>
    %6 = math.absf %5 : vector<4x512xf32>
    %c0_4 = arith.constant 0 : index
    %c0_5 = arith.constant 0 : index
    %7 = vector.load %arg4[%c0_4, %c0_5] : memref<8x512xf32, #tpu.memory_space<vmem>>, vector<1x512xf32>
    %cst = arith.constant dense<0.000000e+00> : vector<512xf32>
    %8 = vector.multi_reduction <add>, %6, %cst [0] : vector<4x512xf32> to vector<512xf32>
    %9 = vector.shape_cast %8 : vector<512xf32> to vector<1x512xf32>
    %10 = arith.addf %7, %9 : vector<1x512xf32>
    %c0_6 = arith.constant 0 : index
    %c0_7 = arith.constant 0 : index
    %11 = vector.load %arg4[%c0_6, %c0_7] : memref<8x512xf32, #tpu.memory_space<vmem>>, vector<1x512xf32>
    tpu.vector_store %arg4[%c0_6, %c0_7], %10 {strides = array<i32>} : memref<8x512xf32, #tpu.memory_space<vmem>>, vector<1x512xf32>,
    return
  }
  func.func @transform_0(%arg0: i32, %arg1: i32) -> (i32, i32) {
    %c1_i32 = arith.constant 1 : i32
    %0 = arith.muli %arg0, %c1_i32 : i32
    %1 = arith.addi %0, %arg1 : i32
    %c0_i32 = arith.constant 0 : i32
    %c0_i32_0 = arith.constant 0 : i32
    return %1, %c0_i32 : i32, i32
  }
  func.func @transform_1(%arg0: i32, %arg1: i32) -> (i32, i32) {
    %c1_i32 = arith.constant 1 : i32
    %0 = arith.muli %arg0, %c1_i32 : i32
    %1 = arith.addi %0, %arg1 : i32
    %c0_i32 = arith.constant 0 : i32
    %c0_i32_0 = arith.constant 0 : i32
    return %1, %c0_i32 : i32, i32
  }
  func.func @transform_2(%arg0: i32, %arg1: i32) -> (i32, i32) {
    %c0_i32 = arith.constant 0 : i32
    %c0_i32_0 = arith.constant 0 : i32
    return %arg0, %c0_i32 : i32, i32
  }
}

</mosaic_0001>

<bundles_post_ra>
// kernel: tpu_custom_call.1
= control target key start
LH: loop header
LB: loop body
LE: loop exit
PB: predicated region body
PF: predicated region fallthrough
CT: control target
= control target key end

     0   :  { %7 = vsyncpa [#allocation3], 0  ;;  %s258_s0 = inlined_call_operand.hbm [shape: f32[4,512], index: 0, kind: input, shape index: {}]   ;;  %s259_s1 = inlined_call_operand.hbm [shape: f32[4,512], index: 1, kind: input, shape index: {}]   ;;  %s260_s2 = inlined_call_operand.hbm [shape: f32[8,512], index: 2, kind: output, shape index: {}]  }
   0x1   :  { %8 = vsyncpa [#allocation6], 0 }
   0x2   :  { %9 = vsyncpa [#allocation4], 0  ;;  %s19_s11 = sshll.u32 %s258_s0, 4  ;;  %s230_s12 = smov [#allocation2]   ;;  %s20_s11 = int_to_ptr.hbm [resolvable:$true] %s19_s11 }
   0x3   :  { %s21_s13 = sshll.u32 %s230_s12, 4  ;;  %s34_s16 = sshll.u32 %s259_s1, 4  ;;  %s22_s13 = int_to_ptr.vmem [resolvable:$true] %s21_s13  ;;  %s35_s16 = int_to_ptr.hbm [resolvable:$true] %s34_s16 }
   0x4   :  { %24 = dma.hbm_to_vmem [thread:$0]  %s20_s11, 256, %s22_s13, [#allocation3]  }
   0x5   :  { %s231_s17 = smov [#allocation5]  }
   0x6   :  { %s36_s18 = sshll.u32 %s231_s17, 4  ;;  %s37_s18 = int_to_ptr.vmem [resolvable:$true] %s36_s18 }
   0x7   :  { %39 = dma.hbm_to_vmem [thread:$0]  %s35_s16, 256, %s37_s18, [#allocation6]  }
   0x8   :  { %224 = dma.done.wait [#allocation3], 256  }
   0x9   :  { %225 = vsyncadd [#allocation3], 4294967040 }
   0xa   :  { %226 = dma.done.wait [#allocation6], 256  }
   0xb   :  { %227 = vsyncadd [#allocation6], 4294967040  ;;  %v232_v0 = vmov 0.0   ;;  %v58_v1 = vld [vmem:[#allocation2] sm:$0xff]  ;;  %v60_v2 = vld [vmem:[#allocation5] sm:$0xff]  ;;  %vm80_vm0 = vcmask 1043456   ;;  %v124_v40 = vlaneseq }
   0xc   :  { %54 = vst [vmem:[#allocation7] sm:$0xff] %v232_v0  ;;  %v59_v3 = vld [vmem:[#allocation2 + $0x8] sm:$0xff]  ;;  %v62_v4 = vsub.f32 %v58_v1, %v60_v2  ;;  %v61_v5 = vld [vmem:[#allocation5 + $0x8] sm:$0xff]  ;;  %vm116_vm1 = vcmask 1040384   ;;  %vm118_vm2 = vcmask 1042434   ;;  %vm120_vm3 = vcmask 1041408  }
   0xd   :  { %55 = vst [vmem:[#allocation7 + $0x8] sm:$0xff] %v232_v0  ;;  %v63_v6 = vsub.f32 %v59_v3, %v61_v5  ;;  %s233_s0 = smov [#allocation7]   ;;  %s137_s21 = sshll.u32 %s260_s2, 4  ;;  %vm126_vm4 = vcmp.lt.s32.totalorder %v124_v40, 512  ;;  %s138_s21 = int_to_ptr.hbm [resolvable:$true] %s137_s21 }
   0xe   :  { %56 = vst [vmem:[#allocation7 + $0x10] sm:$0xff] %v232_v0  ;;  %v64_v7 = vand.u32 2147483647, %v62_v4  ;;  %s135_s1 = sshll.u32 %s233_s0, 4  ;;  %s136_s1 = int_to_ptr.vmem [resolvable:$true] %s135_s1 }
   0xf   :  { %57 = vst [vmem:[#allocation7 + $0x18] sm:$0xff] %v232_v0  ;;  %v65_v8 = vand.u32 2147483647, %v63_v6 }
  0x10   :  { %69 = vst [vmem:[#allocation1] ss:$2 sm:$0xff] %v64_v7 }
  0x11   :  { %71 = vst [vmem:[#allocation1 + $0x10] ss:$2 sm:$0xff] %v65_v8 }
  0x16   :  { %v66_v45 = vld [vmem:[#allocation7] ss:$8 sm:$0xf] }
  0x17   :  { %v72_v9 = vld.sshfl [vmem:[#allocation1] sm:$0xff pattern:$0x75316420]  ;;  %v73_v10 = vld.sshfl [vmem:[#allocation1 + $0x8] sm:$0xff pattern:$0x75316420] }
  0x18   :  { %v74_v11 = vld.sshfl [vmem:[#allocation1 + $0x10] sm:$0xff pattern:$0x75316420]  ;;  %v75_v12 = vld.sshfl [vmem:[#allocation1 + $0x18] sm:$0xff pattern:$0x75316420] }
  0x19   :  { %v81_v13 = vsel %vm80_vm0, %v72_v9, 0.0  ;;  %v88_v14 = vsel %vm80_vm0, %v73_v10, 0.0  ;;  %v95_v15 = vsel %vm80_vm0, %v74_v11, 0.0  ;;  %v102_v16 = vsel %vm80_vm0, %v75_v12, 0.0 }
  0x1a   :  { %v82_v17 = vrot.slane %v81_v13, 4  ;;  %v89_v18 = vrot.slane %v88_v14, 4  ;;  %v96_v19 = vrot.slane %v95_v15, 4  ;;  %v103_v20 = vrot.slane %v102_v16, 4 }
  0x1c   :  { %v83_v21 = vadd.f32 %v82_v17, %v81_v13  ;;  %v90_v22 = vadd.f32 %v89_v18, %v88_v14  ;;  %v97_v23 = vadd.f32 %v96_v19, %v95_v15  ;;  %v104_v24 = vadd.f32 %v103_v20, %v102_v16 }
  0x1e   :  { %v84_v25 = vrot.slane %v83_v21, 2  ;;  %v91_v26 = vrot.slane %v90_v22, 2  ;;  %v98_v27 = vrot.slane %v97_v23, 2  ;;  %v105_v28 = vrot.slane %v104_v24, 2 }
  0x20   :  { %v85_v29 = vadd.f32 %v84_v25, %v83_v21  ;;  %v92_v30 = vadd.f32 %v91_v26, %v90_v22  ;;  %v99_v31 = vadd.f32 %v98_v27, %v97_v23  ;;  %v106_v32 = vadd.f32 %v105_v28, %v104_v24 }
  0x22   :  { %v86_v33 = vrot.slane %v85_v29, 1  ;;  %v93_v34 = vrot.slane %v92_v30, 1  ;;  %v100_v35 = vrot.slane %v99_v31, 1  ;;  %v107_v36 = vrot.slane %v106_v32, 1 }
  0x24   :  { %v94_v37 = vadd.f32 %v93_v34, %v92_v30  ;;  %v101_v38 = vadd.f32 %v100_v35, %v99_v31  ;;  %v108_v39 = vadd.f32 %v107_v36, %v106_v32  ;;  %v87_v41 = vadd.f32 %v86_v33, %v85_v29 }
  0x26   :  { %v113_v42 = vrot.slane %v94_v37, 7  ;;  %v114_v43 = vrot.slane %v101_v38, 6  ;;  %v115_v44 = vrot.slane %v108_v39, 5 }
  0x28   :  { %v117_v46 = vsel %vm116_vm1, %v87_v41, %v113_v42  ;;  %v119_v47 = vsel %vm118_vm2, %v114_v43, %v115_v44 }
  0x29   :  { %v121_v48 = vsel %vm120_vm3, %v117_v46, %v119_v47 }
  0x2a   :  { %v123_v49 = vadd.f32 %v121_v48, %v66_v45 }
  0x2c   :  { %128 = vst.msk [vmem:[#allocation7] ss:$8 sm:$0xf] %vm126_vm4, %v123_v49 }
  0x2d   :  { %140 = dma.vmem_to_hbm [thread:$0]  %s136_s1, 512, %s138_s21, [#allocation4]  }
  0x2e   :  { %228 = dma.done.wait [#allocation4], 512  }
  0x2f   :  { %229 = vsyncadd [#allocation4], 4294966784 }
  0x30   :  { %145 = vsyncpa [#allocation3], 1 }
  0x31   :  { %146 = vsyncpa [#allocation6], 1 }
  0x32   :  { %147 = vsyncpa [#allocation4], 1 }

</bundles_post_ra>
